<compile_context>
chip_gen: v6e
topology: v6e:2x2x1
jax: 0.10.0
libtpu: 0.0.40
codegen_flags: <defaults>
</compile_context>

<pallas_src>
import functools
import math

import jax
import jax.numpy as jnp
from jax.experimental import pallas as pl
from jax.experimental.pallas import tpu as pltpu

_MIB = 1024 * 1024


# --------------------------------------------------------------------------
# VMEM budgeting
# --------------------------------------------------------------------------
def _vmem_limit_bytes():
    """Generation-aware scoped-VMEM limit: half of physical, capped at 64 MiB
    (v5e/v6e: 128 MiB physical -> 64 MiB limit; v7x: 64 MiB -> 32 MiB)."""
    try:
        cap = pltpu.get_tpu_info().vmem_capacity_bytes
    except Exception:
        cap = 64 * _MIB                      # conservative (v7x-sized) fallback
    return max(16 * _MIB, min(cap // 2, 64 * _MIB))


# --------------------------------------------------------------------------
# Shared in-kernel helpers
# --------------------------------------------------------------------------
def _channel_mix(weight, vec):
    """(o, i) x (i, L) -> (o, L) in f32.  MXU dot for realistic channel counts;
    exact broadcast-multiply (VPU) only for sub-vreg channel dims."""
    o, i = weight.shape
    if o >= 8 and i >= 8:
        return jnp.dot(weight, vec, preferred_element_type=jnp.float32)
    return jnp.sum(weight[:, :, None] * vec[None, :, :], axis=1)


def _gates(mean_h, mean_w, w1, b1, w2, b2, w3, b3):
    """conv1 (+ folded BN) + h_swish + conv2/conv3 + sigmoid, all in f32."""
    def branch(m, w_out, b_out):
        t = _channel_mix(w1, m) + b1                              # (mip, L)
        t = t * (jnp.clip(t + 3.0, 0.0, 6.0) * (1.0 / 6.0))       # h_swish
        return jax.nn.sigmoid(_channel_mix(w_out, t) + b_out)     # (c, L)
    return branch(mean_h, w2, b2), branch(mean_w, w3, b3)


def _apply_gates(x, gh, gw, out_dtype):
    """out = x * gh (broadcast over W) * gw (broadcast over H)."""
    if x.dtype == jnp.bfloat16:
        # v6e/v7x have a bf16 VALU; staying in bf16 halves vreg pressure.
        return (x * gh.astype(x.dtype)[:, :, None]
                  * gw.astype(x.dtype)[:, None, :]).astype(out_dtype)
    return (x.astype(jnp.float32) * gh[:, :, None]
            * gw[:, None, :]).astype(out_dtype)


# --------------------------------------------------------------------------
# Fused kernel: pool -> gate -> apply, one HBM read + one HBM write of x.
# --------------------------------------------------------------------------
def _fused_kernel(x_ref, w1_ref, b1_ref, w2_ref, b2_ref, w3_ref, b3_ref,
                  o_ref, *, inv_h, inv_w):
    """Grid = (batch,).  Whole (c, h, w) slab resident in VMEM."""
    x = x_ref[...]                                    # (c, h, w)
    xf = x.astype(jnp.float32)
    mean_h = jnp.sum(xf, axis=-1) * inv_w             # (c, h)  pool over W
    mean_w = jnp.sum(xf, axis=-2) * inv_h             # (c, w)  pool over H
    gh, gw = _gates(mean_h, mean_w,
                    w1_ref[...], b1_ref[...], w2_ref[...], b2_ref[...],
                    w3_ref[...], b3_ref[...])
    o_ref[...] = _apply_gates(x, gh, gw, o_ref.dtype)


# --------------------------------------------------------------------------
# Fallback kernels (per-batch slab exceeds the VMEM budget): 3 tiled stages.
# --------------------------------------------------------------------------
def _pool_kernel(x_ref, mean_h_ref, mean_w_ref, acc_ref, *, inv_h, inv_w):
    """Grid = (batch, c_tiles, w_tiles); trailing w-tile axis is the reduction."""
    k = pl.program_id(2)

    @pl.when(k == 0)
    def _init():
        acc_ref[...] = jnp.zeros_like(acc_ref)

    x = x_ref[...].astype(jnp.float32)                # (ct, h, tw)
    acc_ref[...] += jnp.sum(x, axis=-1)               # (ct, h)  partial over W
    mean_w_ref[...] = jnp.sum(x, axis=-2) * inv_h     # (ct, tw) complete over H

    @pl.when(k == pl.num_programs(2) - 1)
    def _epilogue():
        mean_h_ref[...] = acc_ref[...] * inv_w


def _gate_kernel(mean_h_ref, mean_w_ref, w1_ref, b1_ref, w2_ref, b2_ref,
                 w3_ref, b3_ref, gate_h_ref, gate_w_ref):
    """Grid = (batch,).  O(c*(h+w)*mip) — negligible next to the HBM stages."""
    gh, gw = _gates(mean_h_ref[...], mean_w_ref[...],
                    w1_ref[...], b1_ref[...], w2_ref[...], b2_ref[...],
                    w3_ref[...], b3_ref[...])
    gate_h_ref[...] = gh
    gate_w_ref[...] = gw


def _apply_kernel(x_ref, gate_h_ref, gate_w_ref, o_ref):
    """Grid = (batch, c_tiles, w_tiles), all parallel."""
    o_ref[...] = _apply_gates(x_ref[...], gate_h_ref[...], gate_w_ref[...],
                              o_ref.dtype)


# --------------------------------------------------------------------------
# Tile selection for the fallback path (budget-checked in every branch).
# --------------------------------------------------------------------------
def _fallback_residency(ct, h, wt, x_bytes, out_bytes):
    # Worst stage is "apply": 2x x-in + 2x out (double-buffered), an in-kernel
    # f32 temporary, and the (tiny) gate tiles.
    return (2 * ct * h * wt * x_bytes
            + 2 * ct * h * wt * out_bytes
            + ct * h * wt * 4
            + 4 * (ct * h + ct * wt) * 4)


def _pick_tiles(c, h, w, x_bytes, out_bytes, usable):
    """Pick (c_tile, w_tile): c_tile a multiple of 8 dividing c (or c itself),
    w_tile a multiple of 128 dividing w (or w itself), largest volume that
    keeps the apply stage's double-buffered residency under `usable` bytes."""
    if w % 128 == 0:
        w_cands = [t for t in range(128, w + 1, 128) if w % t == 0]
    else:
        w_cands = [w]
    c_cands = [t for t in range(8, c + 1, 8) if c % t == 0]
    if not c_cands:
        c_cands = [c]
    best = None
    for ct in c_cands:
        for wt in w_cands:
            if _fallback_residency(ct, h, wt, x_bytes, out_bytes) > usable:
                continue
            vol = ct * wt
            if best is None or vol > best[0]:
                best = (vol, ct, wt)
    if best is not None:
        return best[1], best[2]
    # Nothing fits the budget: smallest legal tiles (only reachable for
    # extreme h*w with w % 128 != 0).
    return min(c_cands), min(w_cands)


# --------------------------------------------------------------------------
# Wrapper
# --------------------------------------------------------------------------
def ca_forward(x, params, *, eps=1e-5, force_fallback=False,
               c_tile=None, w_tile=None):
    """x: (b, c, h, w) NCHW.  params: dict of CA weights (see __main__)."""
    b, c, h, w = x.shape
    mip = params["w1"].shape[0]
    f32 = jnp.float32

    x_bytes = jnp.dtype(x.dtype).itemsize
    out_bytes = x_bytes
    vmem_limit = _vmem_limit_bytes()
    usable = int(vmem_limit * 0.75)

    # Fold BatchNorm (inference mode) into conv1.
    scale = params["bn_gamma"].astype(f32) / jnp.sqrt(params["bn_var"].astype(f32) + eps)
    w1f = params["w1"].astype(f32) * scale[:, None]                          # (mip, c)
    b1f = ((params["b1"].astype(f32) - params["bn_mean"].astype(f32)) * scale
           + params["bn_beta"].astype(f32)).reshape(mip, 1)
    w2 = params["w2"].astype(f32)
    b2 = params["b2"].astype(f32).reshape(c, 1)
    w3 = params["w3"].astype(f32)
    b3 = params["b3"].astype(f32).reshape(c, 1)
    weights = (w1f, b1f, w2, b2, w3, b3)
    weight_specs = [
        pl.BlockSpec((mip, c), lambda i: (0, 0)),
        pl.BlockSpec((mip, 1), lambda i: (0, 0)),
        pl.BlockSpec((c, mip), lambda i: (0, 0)),
        pl.BlockSpec((c, 1), lambda i: (0, 0)),
        pl.BlockSpec((c, mip), lambda i: (0, 0)),
        pl.BlockSpec((c, 1), lambda i: (0, 0)),
    ]

    # --- Primary path: fully fused per-batch kernel ---
    slab = c * h * w
    fused_resident = (2 * slab * x_bytes        # x, double-buffered
                      + 2 * slab * out_bytes    # out, double-buffered
                      + 2 * slab * 4)           # in-kernel f32 temporaries
    use_fused = (not force_fallback) and fused_resident <= usable

    if use_fused:
        return pl.pallas_call(
            functools.partial(_fused_kernel, inv_h=1.0 / h, inv_w=1.0 / w),
            out_shape=jax.ShapeDtypeStruct((b, c, h, w), x.dtype),
            grid=(b,),
            in_specs=[pl.BlockSpec((pl.Squeezed(), c, h, w),
                                   lambda i: (i, 0, 0, 0))] + weight_specs,
            out_specs=pl.BlockSpec((pl.Squeezed(), c, h, w),
                                   lambda i: (i, 0, 0, 0)),
            compiler_params=pltpu.CompilerParams(
                dimension_semantics=("parallel",),
                vmem_limit_bytes=vmem_limit),
        )(x, *weights)

    # --- Fallback path: 3 tiled stages ---
    if c_tile is None or w_tile is None:
        ct, wt = _pick_tiles(c, h, w, x_bytes, out_bytes, usable)
        c_tile = c_tile or ct
        w_tile = w_tile or wt
    # Legality guards for user overrides.
    if c % c_tile != 0 or (c_tile != c and c_tile % 8 != 0):
        c_tile = c
    if w % w_tile != 0 or (w_tile != w and w_tile % 128 != 0):
        w_tile = w
    nc = c // c_tile
    nw = w // w_tile

    # Stage 1: pooled means (x read once; lane-dense W-tile reduction trailing).
    mean_h, mean_w = pl.pallas_call(
        functools.partial(_pool_kernel, inv_h=1.0 / h, inv_w=1.0 / w),
        out_shape=(jax.ShapeDtypeStruct((b, c, h), f32),
                   jax.ShapeDtypeStruct((b, c, w), f32)),
        grid=(b, nc, nw),
        in_specs=[pl.BlockSpec((pl.Squeezed(), c_tile, h, w_tile),
                               lambda i, ci, k: (i, ci, 0, k))],
        out_specs=[pl.BlockSpec((pl.Squeezed(), c_tile, h),
                                lambda i, ci, k: (i, ci, 0)),
                   pl.BlockSpec((pl.Squeezed(), c_tile, w_tile),
                                lambda i, ci, k: (i, ci, k))],
        scratch_shapes=[pltpu.VMEM((c_tile, h), f32)],
        compiler_params=pltpu.CompilerParams(
            dimension_semantics=("parallel", "parallel", "arbitrary"),
            vmem_limit_bytes=vmem_limit),
    )(x)

    # Stage 2: tiny gate computation, once per batch element (MXU dots).
    gate_h, gate_w = pl.pallas_call(
        _gate_kernel,
        out_shape=(jax.ShapeDtypeStruct((b, c, h), f32),
                   jax.ShapeDtypeStruct((b, c, w), f32)),
        grid=(b,),
        in_specs=[pl.BlockSpec((pl.Squeezed(), c, h), lambda i: (i, 0, 0)),
                  pl.BlockSpec((pl.Squeezed(), c, w), lambda i: (i, 0, 0))]
                 + weight_specs,
        out_specs=[pl.BlockSpec((pl.Squeezed(), c, h), lambda i: (i, 0, 0)),
                   pl.BlockSpec((pl.Squeezed(), c, w), lambda i: (i, 0, 0))],
        compiler_params=pltpu.CompilerParams(
            dimension_semantics=("parallel",),
            vmem_limit_bytes=vmem_limit),
    )(mean_h, mean_w, *weights)

    # Stage 3: elementwise gating (all axes parallel — feeds both v7x TCs).
    out = pl.pallas_call(
        _apply_kernel,
        out_shape=jax.ShapeDtypeStruct((b, c, h, w), x.dtype),
        grid=(b, nc, nw),
        in_specs=[
            pl.BlockSpec((pl.Squeezed(), c_tile, h, w_tile),
                         lambda i, ci, k: (i, ci, 0, k)),
            pl.BlockSpec((pl.Squeezed(), c_tile, h), lambda i, ci, k: (i, ci, 0)),
            pl.BlockSpec((pl.Squeezed(), c_tile, w_tile),
                         lambda i, ci, k: (i, ci, k)),
        ],
        out_specs=pl.BlockSpec((pl.Squeezed(), c_tile, h, w_tile),
                               lambda i, ci, k: (i, ci, 0, k)),
        compiler_params=pltpu.CompilerParams(
            dimension_semantics=("parallel", "parallel", "parallel"),
            vmem_limit_bytes=vmem_limit),
    )(x, gate_h, gate_w)

    return out


# --------------------------------------------------------------------------
# Pure-JAX reference (eval-mode BN), for verification.
# --------------------------------------------------------------------------
def ca_reference(x, params, eps=1e-5):
    hi = jax.lax.Precision.HIGHEST
    b, c, h, w = x.shape
    xf = x.astype(jnp.float32)
    mh = jnp.mean(xf, axis=3)                       # (b, c, h)  pool over W
    mw = jnp.mean(xf, axis=2)                       # (b, c, w)  pool over H
    y = jnp.concatenate([mh, mw], axis=-1)          # (b, c, h+w)
    t = jnp.einsum("mc,bcl->bml", params["w1"].astype(jnp.float32), y, precision=hi)
    t = t + params["b1"][None, :, None]
    scale = params["bn_gamma"] / jnp.sqrt(params["bn_var"] + eps)
    t = (t - params["bn_mean"][None, :, None]) * scale[None, :, None] \
        + params["bn_beta"][None, :, None]
    t = t * (jnp.clip(t + 3.0, 0.0, 6.0) / 6.0)     # h_swish
    th, tw = t[..., :h], t[..., h:]
    gh = jax.nn.sigmoid(jnp.einsum("cm,bml->bcl", params["w2"], th, precision=hi)
                        + params["b2"][None, :, None])
    gw = jax.nn.sigmoid(jnp.einsum("cm,bml->bcl", params["w3"], tw, precision=hi)
                        + params["b3"][None, :, None])
    out = xf * gw[:, :, None, :] * gh[:, :, :, None]
    return out.astype(x.dtype)


if __name__ == "__main__":
    def make_params(key, c, ratio=16):
        mip = max(8, c // ratio)
        ks = jax.random.split(key, 11)
        return dict(
            w1=jax.random.normal(ks[1], (mip, c), jnp.float32) / math.sqrt(c),
            b1=0.1 * jax.random.normal(ks[2], (mip,), jnp.float32),
            bn_gamma=jax.random.uniform(ks[3], (mip,), jnp.float32, 0.5, 1.5),
            bn_beta=0.1 * jax.random.normal(ks[4], (mip,), jnp.float32),
            bn_mean=0.1 * jax.random.normal(ks[5], (mip,), jnp.float32),
            bn_var=jax.random.uniform(ks[6], (mip,), jnp.float32, 0.5, 1.5),
            w2=jax.random.normal(ks[7], (c, mip), jnp.float32) / math.sqrt(mip),
            b2=0.1 * jax.random.normal(ks[8], (c,), jnp.float32),
            w3=jax.random.normal(ks[9], (c, mip), jnp.float32) / math.sqrt(mip),
            b3=0.1 * jax.random.normal(ks[10], (c,), jnp.float32),
        )

    def run_case(key, b, c, h, w, *, tol=1e-4, **kw):
        kx, kp = jax.random.split(key)
        x = jax.random.normal(kx, (b, c, h, w), jnp.float32)
        params = make_params(kp, c)
        out = jax.block_until_ready(ca_forward(x, params, **kw))
        ref = ca_reference(x, params)
        assert out.shape == (b, c, h, w)
        err = float(jnp.max(jnp.abs(out - ref)))
        assert jnp.allclose(out, ref, atol=tol, rtol=tol), err
        return err

    key = jax.random.PRNGKey(0)
    k1, k2, k3 = jax.random.split(key, 3)
    # Primary small shape implied by the module (fused path, VPU channel mix).
    run_case(k1, 2, 4, 16, 16, tol=1e-4)
    # Larger channel count: fused path with the MXU channel mix.
    run_case(k2, 1, 64, 16, 256, tol=2e-3)
    # Force the tiled 3-stage fallback: exercises the W-tile accumulate +
    # pl.when epilogue, the c-tiled specs, and the standalone gate kernel.
    run_case(k3, 1, 8, 16, 256, tol=2e-3, force_fallback=True, w_tile=128)

    print("KERNEL_OK")
</pallas_src>

<mosaic_0001>
module attributes {stable_mosaic.version = 11 : i64} {
  func.func @_fused_kernel(%arg0: i32, %arg1: memref<1x4x16x16xf32, #tpu.memory_space<vmem>>, %arg2: memref<8x4xf32, #tpu.memory_space<vmem>>, %arg3: memref<8x1xf32, #tpu.memory_space<vmem>>, %arg4: memref<4x8xf32, #tpu.memory_space<vmem>>, %arg5: memref<4x1xf32, #tpu.memory_space<vmem>>, %arg6: memref<4x8xf32, #tpu.memory_space<vmem>>, %arg7: memref<4x1xf32, #tpu.memory_space<vmem>>, %arg8: memref<1x4x16x16xf32, #tpu.memory_space<vmem>>) attributes {dimension_semantics = [#tpu.dimension_semantics<parallel>], iteration_bounds = array<i64: 2>, scalar_prefetch = 0 : i64, scratch_operands = 0 : i64, tpu.core_type = #tpu.core_type<tc>, window_params = [{transform_indices = @transform_0, window_bounds = array<i64: 1, 4, 16, 16>}, {pipeline_mode = #tpu.pipeline_mode<synchronous>, transform_indices = @transform_1, window_bounds = array<i64: 8, 4>}, {pipeline_mode = #tpu.pipeline_mode<synchronous>, transform_indices = @transform_2, window_bounds = array<i64: 8, 1>}, {pipeline_mode = #tpu.pipeline_mode<synchronous>, transform_indices = @transform_3, window_bounds = array<i64: 4, 8>}, {pipeline_mode = #tpu.pipeline_mode<synchronous>, transform_indices = @transform_4, window_bounds = array<i64: 4, 1>}, {pipeline_mode = #tpu.pipeline_mode<synchronous>, transform_indices = @transform_5, window_bounds = array<i64: 4, 8>}, {pipeline_mode = #tpu.pipeline_mode<synchronous>, transform_indices = @transform_6, window_bounds = array<i64: 4, 1>}, {transform_indices = @transform_7, window_bounds = array<i64: 1, 4, 16, 16>}]} {
    %c0 = arith.constant 0 : index
    %c0_0 = arith.constant 0 : index
    %c0_1 = arith.constant 0 : index
    %c0_2 = arith.constant 0 : index
    %0 = vector.load %arg1[%c0, %c0_0, %c0_1, %c0_2] : memref<1x4x16x16xf32, #tpu.memory_space<vmem>>, vector<1x4x16x16xf32>
    %1 = vector.shape_cast %0 : vector<1x4x16x16xf32> to vector<4x16x16xf32>
    %cst = arith.constant dense<0.000000e+00> : vector<4x16xf32>
    %2 = vector.multi_reduction <add>, %1, %cst [2] : vector<4x16x16xf32> to vector<4x16xf32>
    %cst_3 = arith.constant 6.250000e-02 : f32
    %3 = vector.broadcast %cst_3 : f32 to vector<4x16xf32>
    %4 = arith.mulf %2, %3 : vector<4x16xf32>
    %cst_4 = arith.constant dense<0.000000e+00> : vector<4x16xf32>
    %5 = vector.multi_reduction <add>, %1, %cst_4 [1] : vector<4x16x16xf32> to vector<4x16xf32>
    %cst_5 = arith.constant 6.250000e-02 : f32
    %6 = vector.broadcast %cst_5 : f32 to vector<4x16xf32>
    %7 = arith.mulf %5, %6 : vector<4x16xf32>
    %c0_6 = arith.constant 0 : index
    %c0_7 = arith.constant 0 : index
    %8 = vector.load %arg2[%c0_6, %c0_7] : memref<8x4xf32, #tpu.memory_space<vmem>>, vector<8x4xf32>
    %c0_8 = arith.constant 0 : index
    %c0_9 = arith.constant 0 : index
    %9 = vector.load %arg3[%c0_8, %c0_9] : memref<8x1xf32, #tpu.memory_space<vmem>>, vector<8x1xf32>
    %c0_10 = arith.constant 0 : index
    %c0_11 = arith.constant 0 : index
    %10 = vector.load %arg4[%c0_10, %c0_11] : memref<4x8xf32, #tpu.memory_space<vmem>>, vector<4x8xf32>
    %c0_12 = arith.constant 0 : index
    %c0_13 = arith.constant 0 : index
    %11 = vector.load %arg5[%c0_12, %c0_13] : memref<4x1xf32, #tpu.memory_space<vmem>>, vector<4x1xf32>
    %c0_14 = arith.constant 0 : index
    %c0_15 = arith.constant 0 : index
    %12 = vector.load %arg6[%c0_14, %c0_15] : memref<4x8xf32, #tpu.memory_space<vmem>>, vector<4x8xf32>
    %c0_16 = arith.constant 0 : index
    %c0_17 = arith.constant 0 : index
    %13 = vector.load %arg7[%c0_16, %c0_17] : memref<4x1xf32, #tpu.memory_space<vmem>>, vector<4x1xf32>
    %14 = vector.shape_cast %8 : vector<8x4xf32> to vector<8x4x1xf32>
    %15 = vector.shape_cast %4 : vector<4x16xf32> to vector<1x4x16xf32>
    %16 = vector.broadcast %14 : vector<8x4x1xf32> to vector<8x4x16xf32>
    %17 = vector.broadcast %15 : vector<1x4x16xf32> to vector<8x4x16xf32>
    %18 = arith.mulf %16, %17 : vector<8x4x16xf32>
    %cst_18 = arith.constant dense<0.000000e+00> : vector<8x16xf32>
    %19 = vector.multi_reduction <add>, %18, %cst_18 [1] : vector<8x4x16xf32> to vector<8x16xf32>
    %20 = vector.broadcast %9 : vector<8x1xf32> to vector<8x16xf32>
    %21 = arith.addf %19, %20 : vector<8x16xf32>
    %cst_19 = arith.constant 3.000000e+00 : f32
    %22 = vector.broadcast %cst_19 : f32 to vector<8x16xf32>
    %23 = arith.addf %21, %22 : vector<8x16xf32>
    %cst_20 = arith.constant 0.000000e+00 : f32
    %cst_21 = arith.constant 6.000000e+00 : f32
    %24 = vector.broadcast %cst_20 : f32 to vector<8x16xf32>
    %25 = arith.maximumf %24, %23 : vector<8x16xf32>
    %26 = vector.broadcast %cst_21 : f32 to vector<8x16xf32>
    %27 = arith.minimumf %26, %25 : vector<8x16xf32>
    %cst_22 = arith.constant 0.166666672 : f32
    %28 = vector.broadcast %cst_22 : f32 to vector<8x16xf32>
    %29 = arith.mulf %27, %28 : vector<8x16xf32>
    %30 = arith.mulf %21, %29 : vector<8x16xf32>
    %31 = vector.shape_cast %10 : vector<4x8xf32> to vector<4x8x1xf32>
    %32 = vector.shape_cast %30 : vector<8x16xf32> to vector<1x8x16xf32>
    %33 = vector.broadcast %31 : vector<4x8x1xf32> to vector<4x8x16xf32>
    %34 = vector.broadcast %32 : vector<1x8x16xf32> to vector<4x8x16xf32>
    %35 = arith.mulf %33, %34 : vector<4x8x16xf32>
    %cst_23 = arith.constant dense<0.000000e+00> : vector<4x16xf32>
    %36 = vector.multi_reduction <add>, %35, %cst_23 [1] : vector<4x8x16xf32> to vector<4x16xf32>
    %37 = vector.broadcast %11 : vector<4x1xf32> to vector<4x16xf32>
    %38 = arith.addf %36, %37 : vector<4x16xf32>
    %39 = arith.negf %38 : vector<4x16xf32>
    %40 = math.exp %39 : vector<4x16xf32>
    %cst_24 = arith.constant 1.000000e+00 : f32
    %41 = vector.broadcast %cst_24 : f32 to vector<4x16xf32>
    %42 = arith.addf %41, %40 : vector<4x16xf32>
    %43 = arith.divf %41, %42 : vector<4x16xf32>
    %44 = vector.shape_cast %8 : vector<8x4xf32> to vector<8x4x1xf32>
    %45 = vector.shape_cast %7 : vector<4x16xf32> to vector<1x4x16xf32>
    %46 = vector.broadcast %44 : vector<8x4x1xf32> to vector<8x4x16xf32>
    %47 = vector.broadcast %45 : vector<1x4x16xf32> to vector<8x4x16xf32>
    %48 = arith.mulf %46, %47 : vector<8x4x16xf32>
    %cst_25 = arith.constant dense<0.000000e+00> : vector<8x16xf32>
    %49 = vector.multi_reduction <add>, %48, %cst_25 [1] : vector<8x4x16xf32> to vector<8x16xf32>
    %50 = vector.broadcast %9 : vector<8x1xf32> to vector<8x16xf32>
    %51 = arith.addf %49, %50 : vector<8x16xf32>
    %cst_26 = arith.constant 3.000000e+00 : f32
    %52 = vector.broadcast %cst_26 : f32 to vector<8x16xf32>
    %53 = arith.addf %51, %52 : vector<8x16xf32>
    %cst_27 = arith.constant 0.000000e+00 : f32
    %cst_28 = arith.constant 6.000000e+00 : f32
    %54 = vector.broadcast %cst_27 : f32 to vector<8x16xf32>
    %55 = arith.maximumf %54, %53 : vector<8x16xf32>
    %56 = vector.broadcast %cst_28 : f32 to vector<8x16xf32>
    %57 = arith.minimumf %56, %55 : vector<8x16xf32>
    %cst_29 = arith.constant 0.166666672 : f32
    %58 = vector.broadcast %cst_29 : f32 to vector<8x16xf32>
    %59 = arith.mulf %57, %58 : vector<8x16xf32>
    %60 = arith.mulf %51, %59 : vector<8x16xf32>
    %61 = vector.shape_cast %12 : vector<4x8xf32> to vector<4x8x1xf32>
    %62 = vector.shape_cast %60 : vector<8x16xf32> to vector<1x8x16xf32>
    %63 = vector.broadcast %61 : vector<4x8x1xf32> to vector<4x8x16xf32>
    %64 = vector.broadcast %62 : vector<1x8x16xf32> to vector<4x8x16xf32>
    %65 = arith.mulf %63, %64 : vector<4x8x16xf32>
    %cst_30 = arith.constant dense<0.000000e+00> : vector<4x16xf32>
    %66 = vector.multi_reduction <add>, %65, %cst_30 [1] : vector<4x8x16xf32> to vector<4x16xf32>
    %67 = vector.broadcast %13 : vector<4x1xf32> to vector<4x16xf32>
    %68 = arith.addf %66, %67 : vector<4x16xf32>
    %69 = arith.negf %68 : vector<4x16xf32>
    %70 = math.exp %69 : vector<4x16xf32>
    %cst_31 = arith.constant 1.000000e+00 : f32
    %71 = vector.broadcast %cst_31 : f32 to vector<4x16xf32>
    %72 = arith.addf %71, %70 : vector<4x16xf32>
    %73 = arith.divf %71, %72 : vector<4x16xf32>
    %74 = vector.shape_cast %43 : vector<4x16xf32> to vector<4x16x1xf32>
    %75 = vector.broadcast %74 : vector<4x16x1xf32> to vector<4x16x16xf32>
    %76 = arith.mulf %1, %75 : vector<4x16x16xf32>
    %77 = vector.shape_cast %73 : vector<4x16xf32> to vector<4x1x16xf32>
    %78 = vector.broadcast %77 : vector<4x1x16xf32> to vector<4x16x16xf32>
    %79 = arith.mulf %76, %78 : vector<4x16x16xf32>
    %c0_32 = arith.constant 0 : index
    %c0_33 = arith.constant 0 : index
    %c0_34 = arith.constant 0 : index
    %c0_35 = arith.constant 0 : index
    %80 = vector.load %arg8[%c0_32, %c0_33, %c0_34, %c0_35] : memref<1x4x16x16xf32, #tpu.memory_space<vmem>>, vector<1x4x16x16xf32>
    %81 = vector.shape_cast %80 : vector<1x4x16x16xf32> to vector<4x16x16xf32>
    %82 = vector.shape_cast %79 : vector<4x16x16xf32> to vector<1x4x16x16xf32>
    tpu.vector_store %arg8[%c0_32, %c0_33, %c0_34, %c0_35], %82 {strides = array<i32>} : memref<1x4x16x16xf32, #tpu.memory_space<vmem>>, vector<1x4x16x16xf32>,
    return
  }
  func.func @transform_0(%arg0: i32) -> (i32, i32, i32, i32) {
    %c0_i32 = arith.constant 0 : i32
    %c0_i32_0 = arith.constant 0 : i32
    %c0_i32_1 = arith.constant 0 : i32
    %c0_i32_2 = arith.constant 0 : i32
    return %arg0, %c0_i32, %c0_i32_0, %c0_i32_1 : i32, i32, i32, i32
  }
  func.func @transform_1(%arg0: i32) -> (i32, i32) {
    %c0_i32 = arith.constant 0 : i32
    %c0_i32_0 = arith.constant 0 : i32
    %c0_i32_1 = arith.constant 0 : i32
    return %c0_i32, %c0_i32_0 : i32, i32
  }
  func.func @transform_2(%arg0: i32) -> (i32, i32) {
    %c0_i32 = arith.constant 0 : i32
    %c0_i32_0 = arith.constant 0 : i32
    %c0_i32_1 = arith.constant 0 : i32
    return %c0_i32, %c0_i32_0 : i32, i32
  }
  func.func @transform_3(%arg0: i32) -> (i32, i32) {
    %c0_i32 = arith.constant 0 : i32
    %c0_i32_0 = arith.constant 0 : i32
    %c0_i32_1 = arith.constant 0 : i32
    return %c0_i32, %c0_i32_0 : i32, i32
  }
  func.func @transform_4(%arg0: i32) -> (i32, i32) {
    %c0_i32 = arith.constant 0 : i32
    %c0_i32_0 = arith.constant 0 : i32
    %c0_i32_1 = arith.constant 0 : i32
    return %c0_i32, %c0_i32_0 : i32, i32
  }
  func.func @transform_5(%arg0: i32) -> (i32, i32) {
    %c0_i32 = arith.constant 0 : i32
    %c0_i32_0 = arith.constant 0 : i32
    %c0_i32_1 = arith.constant 0 : i32
    return %c0_i32, %c0_i32_0 : i32, i32
  }
  func.func @transform_6(%arg0: i32) -> (i32, i32) {
    %c0_i32 = arith.constant 0 : i32
    %c0_i32_0 = arith.constant 0 : i32
    %c0_i32_1 = arith.constant 0 : i32
    return %c0_i32, %c0_i32_0 : i32, i32
  }
  func.func @transform_7(%arg0: i32) -> (i32, i32, i32, i32) {
    %c0_i32 = arith.constant 0 : i32
    %c0_i32_0 = arith.constant 0 : i32
    %c0_i32_1 = arith.constant 0 : i32
    %c0_i32_2 = arith.constant 0 : i32
    return %arg0, %c0_i32, %c0_i32_0, %c0_i32_1 : i32, i32, i32, i32
  }
}

</mosaic_0001>

<bundles_post_ra>
// kernel: tpu_custom_call.1
= control target key start
LH: loop header
LB: loop body
LE: loop exit
PB: predicated region body
PF: predicated region fallthrough
CT: control target
= control target key end

     0   :  { %12 = vsyncpa [#allocation3], 0  ;;  %s1859_s0 = inlined_call_operand.hbm [shape: f32[2,4,16,16], index: 0, kind: input, shape index: {}]   ;;  %s1860_s1 = inlined_call_operand.vmem [shape: f32[8,4], index: 1, kind: input, shape index: {}]   ;;  %s1861_s2 = inlined_call_operand.vmem [shape: f32[8,1], index: 2, kind: input, shape index: {}]   ;;  %s1862_s3 = inlined_call_operand.vmem [shape: f32[4,8], index: 3, kind: input, shape index: {}]   ;;  %s1863_s4 = inlined_call_operand.vmem [shape: f32[4,1], index: 4, kind: input, shape index: {}]   ;;  %s1864_s5 = inlined_call_operand.vmem [shape: f32[4,8], index: 5, kind: input, shape index: {}]   ;;  %s1865_s6 = inlined_call_operand.vmem [shape: f32[4,1], index: 6, kind: input, shape index: {}]   ;;  %s1866_s7 = inlined_call_operand.hbm [shape: f32[2,4,16,16], index: 7, kind: output, shape index: {}]  }
   0x1   :  { %14 = vsyncpa [#allocation3 + $0x1], 0 }
   0x2   :  { %15 = vsyncpa [#allocation4], 0 }
   0x3   :  { %17 = vsyncpa [#allocation4 + $0x1], 0  ;;  %s1416_s24 = smov 0   ;;  %s1418_s25 = smov 0  }
   0x4   :  { %s1420_s26 = smov 0   ;;  %s1422_s27 = smov 0  }
   0x5 LB: > { %s1437_s28 = sadd.s32 4294967295, %s1367_s27   ;;  %s1158_s29 = sadd.s32 4294967294, %s1367_s27   ;;  %s1367_s27 = sphi %s1422_s27, %s1881_s27   ;;  %s1363_s26 = sphi %s1420_s26, %s1880_s26   ;;  %s1359_s25 = sphi %s1418_s25, %s1879_s25   ;;  %s1355_s24 = sphi %s1416_s24, %s1878_s24  }
   0x6   : > { %s1441_s30 = sadd.s32 1, %s1367_s27   ;;  %s30_s8 = sadd.s32 1, %s1363_s26 }
   0x7   : > { %s27_s9 = ssub.s32 %s1367_s27, %s1441_s30  ;;  %p37_p0 = scmp.ne.s32.totalorder %s1363_s26, %s1359_s25 }
   0x8   : > { %p28_p1 = scmp.eq.s32.totalorder %s27_s9, 0  ;;  %p38_p2 = scmp.eq.s32.totalorder %s1367_s27, 0 }
   0x9   : > { %p43_p3 = scmp.ne.s32.totalorder %s1359_s25, %s1355_s24  ;;  %p44_p4 = scmp.eq.s32.totalorder %s1437_s28, 0 }
   0xa   : > { %s1453_s10 = scalar_select %p28_p1, %s1363_s26, %s30_s8  }
   0xb   : > { %p1455_p5 = por %p38_p2, %p37_p0  ;;  %p1459_p6 = por %p44_p4, %p43_p3 }
   0xc   : > { %p193_p7 = scmp.eq.s32.totalorder %s1437_s28, 1  ;;  %p199_p8 = scmp.eq.s32.totalorder %s1158_s29, 1 }
   0xd   : > { %s1870_s12 = scalar_select %p1459_p6, 1, 0 }
   0xe   : > { %p1194_p10 = scmp.lt.s32.totalorder %s1367_s27, 2  ;;  %p1466_p11 = por %p193_p7, %p37_p0 }
   0xf   : > { %p1470_p12 = por %p199_p8, %p43_p3  ;;  %s237_s15 = sand.u32 1, %s1363_s26  }
  0x10   : > { %s1871_s13 = scalar_select %p1466_p11, 1, 0 }
  0x11   : > { %s1872_s14 = scalar_select %p1470_p12, 1, 0 }
  0x12   : > { %s1180_s16 = sshll.u32 %s1367_s27, 10  ;;  %s1161_s17 = sshll.u32 %s237_s15, 6 }
  0x13   : > { %s1479_s20 = scalar_lea.hbm %s1859_s0, %s1180_s16  ;;  %s241_s21 = scalar_lea.vmem [#allocation2], %s1161_s17 }
  0x14   : > { %s248_s22 = sshll.u32 %s241_s21, 4  ;;  %p1483_p13 = pnand %p1194_p10, %p1455_p5  ;;  %s1487_s22 = int_to_ptr.vmem [resolvable:$true] %s248_s22 }
  0x15   : > { %s1489_s29 = scalar_lea.sflag [#allocation3], %s237_s15  ;;  %s1275_s8 = scalar_lea.hbm %s1479_s20, 1024 }
  0x16   : > { %p1276_p0 = scmp.ne.s32.totalorder %s1479_s20, %s1275_s8  ;;  %p1277_p1 = pneg %p1483_p13 }
  0x17   : > { %s1280_s17 = scalar_lea.hbm %s1859_s0, 2048  ;;  %p1281_p4 = scmp.lt.s32.totalorder %s1479_s20, %s1859_s0 }
  0x18   : > { %p1278_p2 = pnand %p1277_p1, %p1276_p0  ;;  %p1282_p5 = scmp.lt.s32.totalorder %s1280_s17, %s1275_s8 }
  0x1a   : > { %p1279_p3 = pneg %p1278_p2  ;;  %p1283_p7 = por %p1282_p5, %p1281_p4 }
  0x1c   : > { %p1284_p8 = pnand %p1283_p7, %p1279_p3 }
  0x1e   : > { %1287 = shalt.err (!%p1284_p8)
}
  0x1f   : > { %s1288_s15 = scalar_lea.vmem %s1487_s22, 1024  ;;  %s1369_s19 = smov [#allocation2]  }
  0x20   : > { %p1289_p10 = scmp.ne.s32.totalorder %s1487_s22, %s1288_s15  ;;  %s1293_s21 = sshll.u32 %s1369_s19, 4  ;;  %s1294_s21 = int_to_ptr.vmem [resolvable:$false] %s1293_s21 }
  0x21   : > { %s1295_s9 = scalar_lea.vmem %s1294_s21, 2048  ;;  %p1296_p2 = scmp.lt.s32.totalorder %s1487_s22, %s1294_s21 }
  0x22   : > { %p1291_p9 = pnand %p1289_p10, %p1277_p1  ;;  %p1297_p12 = scmp.lt.s32.totalorder %s1295_s9, %s1288_s15 }
  0x24   : > { %p1292_p0 = pneg %p1291_p9  ;;  %p1298_p11 = por %p1297_p12, %p1296_p2 }
  0x26   : > { %p1299_p6 = pnand %p1298_p11, %p1292_p0 }
  0x28   : > { %1302 = shalt.err (!%p1299_p6)
}
  0x29   : > { %s1370_s8 = smov 128   ;;  %s1371_s16 = smov 8  }
  0x2a   : > { %1189 = dma.hbm_to_vmem [thread:$0]  (!%p1483_p13), %s1479_s20, 1024, %s1487_s22, %s1489_s29, %s1370_s8, %s1370_s8, %s1371_s16  }
  0x2b   : > { %p1164_p9 = scmp.ge.s32.totalorder %s1367_s27, 1  ;;  %p256_p1 = scmp.lt.s32.totalorder %s1367_s27, 3 }
  0x2d   : > { %p257_p3 = pnand %p1164_p9, %p256_p1 }
  0x2e   : > { %s1513_s17 = sand.u32 (!%p257_p3), 1, %s1359_s25   ;;  %p1874_p6 = scmp.ne.s32.totalorder (!%p257_p3), %s1870_s12, 0 }
  0x2f   : > { %260 = sbr.rel (%p257_p3) target bundleno = 462 (0x1ce), region = 48  ;;  %s1165_s11 = sshll.u32 (!%p257_p3), %s1513_s17, 6 }
  0x30   : > { %s263_s18 = scalar_lea.sflag (!%p257_p3), [#allocation3], %s1513_s17  ;;  %s1519_s15 = scalar_lea.vmem (!%p257_p3), [#allocation2], %s1165_s11 }
  0x34   : > { %1346 = dma.done.wait (%p1874_p6), %s263_s18, 1024  }
  0x35   : > { %1348 = vsyncadd (%p1874_p6), %s263_s18, 4294966272  ;;  %v376_v0 = vlaneseq  ;;  %v1372_v1 = vmov 0   ;;  %vm305_vm0 = vcmask 130048   ;;  %v299_v4 = vld [vmem:[%s1519_s15 + $0x10] sm:$0xff]  ;;  %v297_v5 = vld [vmem:[%s1519_s15] sm:$0xff]  ;;  %vm482_vm1 = vcmask 1042434  }
  0x36   : > { %1233 = vset.pattern.permute.xlu0 %v1372_v1  ;;  %1234 = vset.pattern.permute.xlu1 %v1372_v1  ;;  %v300_v6 = vld [vmem:[%s1519_s15 + $0x18] sm:$0xff]  ;;  %v312_v8 = vsel %vm305_vm0, %v299_v4, 0.0  ;;  %v306_v9 = vsel %vm305_vm0, %v297_v5, 0.0  ;;  %v298_v11 = vld [vmem:[%s1519_s15 + $0x8] sm:$0xff]  ;;  %v301_v13 = vld [vmem:[%s1519_s15 + $0x20] sm:$0xff]  ;;  %vm480_vm2 = vcmask 1041409  }
  0x37   : > { %v441_v2 = vand.u32 127, %v376_v0  ;;  %v1525_v3 = vshrl.u32 %v376_v0, 7  ;;  %v315_v10 = vsel %vm305_vm0, %v300_v6, 0.0  ;;  %v302_v12 = vld [vmem:[%s1519_s15 + $0x28] sm:$0xff]  ;;  %313 = vadd.xlane.f32.xlu1 %v312_v8  ;;  %307 = vadd.xlane.f32.xlu0 %v306_v9  ;;  %v309_v15 = vsel %vm305_vm0, %v298_v11, 0.0  ;;  %v304_v18 = vld [vmem:[%s1519_s15 + $0x38] sm:$0xff] }
  0x38   : > { %v345_v14 = vadd.f32 %v315_v10, %v312_v8  ;;  %v321_v16 = vsel %vm305_vm0, %v302_v12, 0.0  ;;  %v318_v17 = vsel %vm305_vm0, %v301_v13, 0.0  ;;  %v303_v19 = vld [vmem:[%s1519_s15 + $0x30] sm:$0xff]  ;;  %v338_v20 = vadd.f32 %v309_v15, %v306_v9  ;;  %v370_v59 = vld [vmem:[%s1860_s1] sm:$0xff]  ;;  %s1782_s20 = scalar_lea.vmem [#allocation5], %s1165_s11  ;;  %s1181_s11 = sshll.u32 %s1437_s28, 10 }
  0x39   : > { %v1531_v7 = vsub.s32 %v441_v2, %v1525_v3  ;;  %v352_v21 = vadd.f32 %v321_v16, %v318_v17  ;;  %v327_v22 = vsel %vm305_vm0, %v304_v18, 0.0  ;;  %v324_v23 = vsel %vm305_vm0, %v303_v19, 0.0  ;;  %v371_v13 = vld [vmem:[%s1861_s2] sm:$0xff]  ;;  %s1085_s22 = sshll.u32 %s1782_s20, 4  ;;  %s1810_s28 = scalar_lea.hbm %s1866_s7, %s1181_s11  ;;  %s1812_s22 = int_to_ptr.vmem [resolvable:$true] %s1085_s22 }
  0x3a   : > { %v346_v24 = vrot.slane %v345_v14, 4  ;;  %v359_v25 = vadd.f32 %v327_v22, %v324_v23  ;;  %v339_v26 = vrot.slane %v338_v20, 4  ;;  %v446_v46 = vadd.s32 4294967288, %v441_v2  ;;  %v374_v18 = vld [vmem:[%s1864_s5] sm:$0xf]  ;;  %s1072_s19 = scalar_lea.sflag [#allocation4], %s1513_s17 }
  0x3b   : > { %v353_v27 = vrot.slane %v352_v21, 4  ;;  %316 = vadd.xlane.f32.xlu1 %v315_v10  ;;  %310 = vadd.xlane.f32.xlu0 %v309_v15  ;;  %vm484_vm3 = vcmask 1043459   ;;  %v392_v58 = vsub.s32 2, %v1525_v3  ;;  %v1559_v61 = vsub.s32 0, %v1525_v3  ;;  %s1303_s21 = scalar_lea.vmem %s1812_s22, 1024  ;;  %p1875_p12 = scmp.ne.s32.totalorder %s1871_s13, 0 }
  0x3c   : > { %v347_v28 = vadd.f32 %v346_v24, %v345_v14  ;;  %v360_v29 = vrot.slane %v359_v25, 4  ;;  %v340_v30 = vadd.f32 %v339_v26, %v338_v20  ;;  %v1547_v51 = vsub.s32 %v446_v46, %v1525_v3  ;;  %v372_v14 = vld [vmem:[%s1862_s3] sm:$0xf]  ;;  %p1304_p11 = scmp.ne.s32.totalorder %s1812_s22, %s1303_s21 }
  0x3d   : > { %v354_v31 = vadd.f32 %v353_v27, %v352_v21  ;;  %v393_v60 = vrot.slane %v370_v59, %v392_v58  ;;  %v385_v62 = vsub.s32 1, %v1525_v3  ;;  %v379_v63 = vrot.slane %v370_v59, %v1559_v61  ;;  %v375_v24 = vld [vmem:[%s1865_s6] sm:$0xf] }
  0x3e   : > { %v348_v32 = vrot.slane %v347_v28, 2  ;;  %v361_v33 = vadd.f32 %v360_v29, %v359_v25  ;;  %v341_v34 = vrot.slane %v340_v30, 2  ;;  %v399_v0 = vsub.s32 3, %v1525_v3  ;;  %p1305_p13 = pnand %p1304_p11, %p1875_p12 }
  0x3f   : > { %v355_v35 = vrot.slane %v354_v31, 2  ;;  %322 = vadd.xlane.f32.xlu1 %v321_v16  ;;  %319 = vadd.xlane.f32.xlu0 %v318_v17  ;;  %v386_v1 = vrot.slane %v370_v59, %v385_v62  ;;  %v406_v2 = vsub.s32 4, %v1525_v3  ;;  %v413_v5 = vsub.s32 5, %v1525_v3  ;;  %v373_v17 = vld [vmem:[%s1863_s4] sm:$0xf] }
  0x40   : > { %v349_v36 = vadd.f32 %v348_v32, %v347_v28  ;;  %v362_v37 = vrot.slane %v361_v33, 2  ;;  %v342_v38 = vadd.f32 %v341_v34, %v340_v30  ;;  %v400_v4 = vrot.slane %v370_v59, %v399_v0  ;;  %p1306_p4 = pneg %p1305_p13 }
  0x41   : > { %v356_v39 = vadd.f32 %v355_v35, %v354_v31  ;;  %v407_v6 = vrot.slane %v370_v59, %v406_v2  ;;  %v420_v8 = vsub.s32 6, %v1525_v3  ;;  %v414_v9 = vrot.slane %v370_v59, %v413_v5 }
  0x42   : > { %v350_v40 = vrot.slane %v349_v36, 1  ;;  %v363_v41 = vadd.f32 %v362_v37, %v361_v33  ;;  %v343_v42 = vrot.slane %v342_v38, 1  ;;  %v427_v10 = vsub.s32 7, %v1525_v3 }
  0x43   : > { %v357_v43 = vrot.slane %v356_v39, 1  ;;  %328 = vadd.xlane.f32.xlu1 %v327_v22  ;;  %325 = vadd.xlane.f32.xlu0 %v324_v23  ;;  %v421_v11 = vrot.slane %v370_v59, %v420_v8  ;;  %v622_v15 = vrot.slane %v372_v14, %v1559_v61  ;;  %v636_v16 = vrot.slane %v372_v14, %v392_v58 }
  0x44   : > { %v351_v44 = vadd.f32 %v350_v40, %v349_v36  ;;  %v364_v45 = vrot.slane %v363_v41, 1  ;;  %v344_v47 = vadd.f32 %v343_v42, %v342_v38  ;;  %v428_v12 = vrot.slane %v370_v59, %v427_v10 }
  0x45   : > { %v358_v48 = vadd.f32 %v357_v43, %v356_v39  ;;  %v629_v3 = vrot.slane %v372_v14, %v385_v62  ;;  %v643_v19 = vrot.slane %v372_v14, %v399_v0  ;;  %v875_v20 = vrot.slane %v374_v18, %v385_v62 }
  0x46   : > { %v367_v49 = vmul.f32 0.0625, %v351_v44  ;;  %v365_v50 = vadd.f32 %v364_v45, %v363_v41  ;;  %v366_v52 = vmul.f32 0.0625, %v344_v47  ;;  %v868_v21 = vrot.slane %v374_v18, %v1559_v61 }
  0x47   : > { %v368_v53 = vmul.f32 0.0625, %v358_v48  ;;  %v889_v22 = vrot.slane %v374_v18, %v399_v0  ;;  %v882_v23 = vrot.slane %v374_v18, %v392_v58  ;;  %vm451_vm4 = vcmask 130112  }
  0x48   : > { %v369_v54 = vmul.f32 0.0625, %v365_v50  ;;  %v749_v55 = vsel %vm480_vm2, %v367_v49, %v366_v52  ;;  %vm495_vm5 = vcmask 125952   ;;  %vm662_vm6 = vcmask 1044484  }
  0x49   : > { %v750_v56 = vsel %vm482_vm1, %v368_v53, %v749_v55  ;;  %vm665_vm7 = vcmask 1045509   ;;  %vm668_vm8 = vcmask 1046534   ;;  %vm671_vm9 = vcmask 1047559  }
  0x4a   : > { %v1552_v57 = vsel %vm484_vm3, %v369_v54, %v750_v56 }
  0x54   : > { %395 = vbcast.lane.b32.xlu1 %v393_v60, 256 }
  0x58   : > { %381 = vbcast.lane.b32.xlu1 %v379_v63, 256 }
  0x59   : > { %388 = vbcast.lane.b32.xlu0 %v386_v1, 256 }
  0x5c   : > { %402 = vbcast.lane.b32.xlu1 %v400_v4, 256 }
  0x5d   : > { %409 = vbcast.lane.b32.xlu0 %v407_v6, 256 }
  0x60   : > { %416 = vbcast.lane.b32.xlu1 %v414_v9, 256 }
  0x61   : > { %423 = vbcast.lane.b32.xlu0 %v421_v11, 256 }
  0x64   : > { %430 = vbcast.lane.b32.xlu1 %v428_v12, 256 }
  0x65   : > { %554 = vperm.xlu0 %1233, %v371_v13  }
  0x68   : > { %624 = vbcast.lane.b32.xlu1 %v622_v15, 256 }
  0x69   : > { %638 = vbcast.lane.b32.xlu0 %v636_v16, 256 }
  0x6c   : > { %631 = vbcast.lane.b32.xlu1 %v629_v3, 256 }
  0x6d   : > { %708 = vperm.xlu0 %1233, %v373_v17  }
  0x70   : > { %645 = vbcast.lane.b32.xlu1 %v643_v19, 256 }
  0x71   : > { %877 = vbcast.lane.b32.xlu0 %v875_v20, 256 }
  0x74   : > { %870 = vbcast.lane.b32.xlu1 %v868_v21, 256 }
  0x75   : > { %891 = vbcast.lane.b32.xlu0 %v889_v22, 256 }
  0x78   : > { %884 = vbcast.lane.b32.xlu1 %v882_v23, 256 }
  0x7c   : > { %950 = vperm.xlu1 %1234, %v375_v24  }
  0xc0   : > { %v314_v25 = vpop.xlane.xlu1 %313  ;;  %v308_v26 = vpop.xlane.xlu0 %307 }
  0xc1   : > { %v330_v27 = vmul.f32 0.0625, %v308_v26  ;;  %v332_v28 = vmul.f32 0.0625, %v314_v25 }
  0xc3   : > { %v445_v31 = vrot.slane %v330_v27, %v1531_v7  ;;  %v456_v34 = vrot.slane %v332_v28, %v1531_v7 }
  0xc4   : > { %v317_v29 = vpop.xlane.xlu1 %316  ;;  %v311_v30 = vpop.xlane.xlu0 %310 }
  0xc5   : > { %v333_v32 = vmul.f32 0.0625, %v317_v29  ;;  %v331_v33 = vmul.f32 0.0625, %v311_v30 }
  0xc7   : > { %v460_v35 = vrot.slane %v333_v32, %v1547_v51  ;;  %v450_v36 = vrot.slane %v331_v33, %v1547_v51 }
  0xc8   : > { %v323_v37 = vpop.xlane.xlu1 %322  ;;  %v320_v38 = vpop.xlane.xlu0 %319 }
  0xc9   : > { %v461_v39 = vsel %vm451_vm4, %v460_v35, %v456_v34  ;;  %v452_v40 = vsel %vm451_vm4, %v450_v36, %v445_v31  ;;  %v335_v41 = vmul.f32 0.0625, %v323_v37  ;;  %v334_v42 = vmul.f32 0.0625, %v320_v38 }
  0xca   : > { %v481_v43 = vsel %vm480_vm2, %v461_v39, %v452_v40 }
  0xcb   : > { %v469_v44 = vrot.slane %v335_v41, %v1547_v51  ;;  %v465_v45 = vrot.slane %v334_v42, %v1531_v7 }
  0xcc   : > { %v329_v46 = vpop.xlane.xlu1 %328  ;;  %v326_v47 = vpop.xlane.xlu0 %325 }
  0xcd   : > { %v470_v48 = vsel %vm451_vm4, %v469_v44, %v465_v45  ;;  %v337_v49 = vmul.f32 0.0625, %v329_v46  ;;  %v336_v50 = vmul.f32 0.0625, %v326_v47 }
  0xce   : > { %v483_v52 = vsel %vm482_vm1, %v470_v48, %v481_v43 }
  0xcf   : > { %v478_v53 = vrot.slane %v337_v49, %v1547_v51  ;;  %v474_v54 = vrot.slane %v336_v50, %v1531_v7 }
  0xd0   : > { %v396_v55 = vpop.permute.xlu1 %395  ;;  %v389_v56 = vpop.permute.xlu0 %388 }
  0xd1   : > { %v479_v58 = vsel %vm451_vm4, %v478_v53, %v474_v54  ;;  %v755_v59 = vmul.f32 %v1552_v57, %v396_v55  ;;  %v754_v60 = vmul.f32 %v1552_v57, %v389_v56 }
  0xd2   : > { %v1602_v62 = vsel %vm484_vm3, %v479_v58, %v483_v52 }
  0xd3   : > { %v489_v63 = vmul.f32 %v1602_v62, %v396_v55  ;;  %v775_v0 = vsel %vm495_vm5, %v755_v59, 0.0  ;;  %v488_v51 = vmul.f32 %v1602_v62, %v389_v56  ;;  %v768_v7 = vsel %vm495_vm5, %v754_v60, 0.0 }
  0xd4   : > { %v776_v1 = vrot.slane %v775_v0, 4  ;;  %v769_v2 = vrot.slane %v768_v7, 4  ;;  %v382_v4 = vpop.permute.xlu1 %381  ;;  %v410_v5 = vpop.permute.xlu0 %409 }
  0xd5   : > { %v510_v6 = vsel %vm495_vm5, %v489_v63, 0.0  ;;  %v503_v8 = vsel %vm495_vm5, %v488_v51, 0.0  ;;  %v487_v9 = vmul.f32 %v1602_v62, %v382_v4  ;;  %v753_v10 = vmul.f32 %v1552_v57, %v382_v4 }
  0xd6   : > { %v511_v11 = vrot.slane %v510_v6, 4  ;;  %v777_v12 = vadd.f32 %v776_v1, %v775_v0  ;;  %v504_v13 = vrot.slane %v503_v8, 4  ;;  %v770_v14 = vadd.f32 %v769_v2, %v768_v7 }
  0xd7   : > { %v496_v15 = vsel %vm495_vm5, %v487_v9, 0.0  ;;  %v761_v16 = vsel %vm495_vm5, %v753_v10, 0.0  ;;  %v491_v3 = vmul.f32 %v1602_v62, %v410_v5  ;;  %v757_v17 = vmul.f32 %v1552_v57, %v410_v5 }
  0xd8   : > { %v512_v18 = vadd.f32 %v511_v11, %v510_v6  ;;  %v778_v19 = vrot.slane %v777_v12, 2  ;;  %v505_v20 = vadd.f32 %v504_v13, %v503_v8  ;;  %v771_v21 = vrot.slane %v770_v14, 2  ;;  %v403_v22 = vpop.permute.xlu1 %402  ;;  %v424_v52 = vpop.permute.xlu0 %423 }
  0xd9   : > { %v497_v23 = vrot.slane %v496_v15, 4  ;;  %v762_v24 = vrot.slane %v761_v16, 4  ;;  %v524_v25 = vsel %vm495_vm5, %v491_v3, 0.0  ;;  %v789_v26 = vsel %vm495_vm5, %v757_v17, 0.0 }
  0xda   : > { %v513_v27 = vrot.slane %v512_v18, 2  ;;  %v779_v28 = vadd.f32 %v778_v19, %v777_v12  ;;  %v506_v29 = vrot.slane %v505_v20, 2  ;;  %v772_v30 = vadd.f32 %v771_v21, %v770_v14 }
  0xdb   : > { %v498_v31 = vadd.f32 %v497_v23, %v496_v15  ;;  %v763_v32 = vadd.f32 %v762_v24, %v761_v16  ;;  %v525_v33 = vrot.slane %v524_v25, 4  ;;  %v790_v34 = vrot.slane %v789_v26, 4 }
  0xdc   : > { %v514_v35 = vadd.f32 %v513_v27, %v512_v18  ;;  %v780_v36 = vrot.slane %v779_v28, 1  ;;  %v507_v37 = vadd.f32 %v506_v29, %v505_v20  ;;  %v773_v38 = vrot.slane %v772_v30, 1  ;;  %v417_v46 = vpop.permute.xlu1 %416 }
  0xdd   : > { %v499_v39 = vrot.slane %v498_v31, 2  ;;  %v764_v40 = vrot.slane %v763_v32, 2  ;;  %v526_v41 = vadd.f32 %v525_v33, %v524_v25  ;;  %v791_v42 = vadd.f32 %v790_v34, %v789_v26 }
  0xde   : > { %v515_v43 = vrot.slane %v514_v35, 1  ;;  %v1618_v44 = vadd.f32 %v780_v36, %v779_v28  ;;  %v508_v45 = vrot.slane %v507_v37, 1  ;;  %v1622_v54 = vadd.f32 %v773_v38, %v772_v30 }
  0xdf   : > { %v500_v47 = vadd.f32 %v499_v39, %v498_v31  ;;  %v765_v48 = vadd.f32 %v764_v40, %v763_v32  ;;  %v527_v49 = vrot.slane %v526_v41, 2  ;;  %v792_v50 = vrot.slane %v791_v42, 2 }
  0xe0   : > { %v1620_v53 = vadd.f32 %v515_v43, %v514_v35  ;;  %v490_v55 = vmul.f32 %v1602_v62, %v403_v22  ;;  %v756_v56 = vmul.f32 %v1552_v57, %v403_v22  ;;  %v493_v7 = vmul.f32 %v1602_v62, %v424_v52  ;;  %v431_v12 = vpop.permute.xlu1 %430 }
  0xe1   : > { %v501_v58 = vrot.slane %v500_v47, 1  ;;  %v766_v59 = vrot.slane %v765_v48, 1  ;;  %v528_v60 = vadd.f32 %v527_v49, %v526_v41  ;;  %v793_v63 = vadd.f32 %v792_v50, %v791_v42 }
  0xe2   : > { %v517_v0 = vsel %vm495_vm5, %v490_v55, 0.0  ;;  %v782_v51 = vsel %vm495_vm5, %v756_v56, 0.0  ;;  %v759_v1 = vmul.f32 %v1552_v57, %v424_v52  ;;  %v1630_v2 = vadd.f32 %v508_v45, %v507_v37 }
  0xe3   : > { %v1632_v4 = vadd.f32 %v501_v58, %v500_v47  ;;  %v1634_v5 = vadd.f32 %v766_v59, %v765_v48  ;;  %v529_v6 = vrot.slane %v528_v60, 1  ;;  %v518_v8 = vrot.slane %v517_v0, 4  ;;  %v1650_v47 = vpop.permute.xlu0 %554 }
  0xe4   : > { %v783_v9 = vrot.slane %v782_v51, 4  ;;  %v538_v10 = vsel %vm495_vm5, %v493_v7, 0.0  ;;  %v803_v11 = vsel %vm495_vm5, %v759_v1, 0.0  ;;  %v794_v14 = vrot.slane %v793_v63, 1 }
  0xe5   : > { %v1638_v13 = vadd.f32 %v529_v6, %v528_v60  ;;  %v539_v15 = vrot.slane %v538_v10, 4  ;;  %v804_v16 = vrot.slane %v803_v11, 4  ;;  %v519_v3 = vadd.f32 %v518_v8, %v517_v0 }
  0xe6   : > { %v784_v17 = vadd.f32 %v783_v9, %v782_v51  ;;  %v492_v18 = vmul.f32 %v1602_v62, %v417_v46  ;;  %v758_v19 = vmul.f32 %v1552_v57, %v417_v46  ;;  %v494_v22 = vmul.f32 %v1602_v62, %v431_v12 }
  0xe7   : > { %v540_v20 = vadd.f32 %v539_v15, %v538_v10  ;;  %v805_v21 = vadd.f32 %v804_v16, %v803_v11  ;;  %v760_v23 = vmul.f32 %v1552_v57, %v431_v12  ;;  %v520_v24 = vrot.slane %v519_v3, 2 }
  0xe8   : > { %v785_v25 = vrot.slane %v784_v17, 2  ;;  %v531_v26 = vsel %vm495_vm5, %v492_v18, 0.0  ;;  %v796_v27 = vsel %vm495_vm5, %v758_v19, 0.0  ;;  %v545_v34 = vsel %vm495_vm5, %v494_v22, 0.0 }
  0xe9   : > { %v541_v28 = vrot.slane %v540_v20, 2  ;;  %v806_v29 = vrot.slane %v805_v21, 2  ;;  %v532_v30 = vrot.slane %v531_v26, 4  ;;  %v797_v31 = vrot.slane %v796_v27, 4 }
  0xea   : > { %v521_v32 = vadd.f32 %v520_v24, %v519_v3  ;;  %v786_v33 = vadd.f32 %v785_v25, %v784_v17  ;;  %v810_v35 = vsel %vm495_vm5, %v760_v23, 0.0  ;;  %v546_v40 = vrot.slane %v545_v34, 4 }
  0xeb   : > { %v542_v36 = vadd.f32 %v541_v28, %v540_v20  ;;  %v807_v62 = vadd.f32 %v806_v29, %v805_v21  ;;  %v533_v37 = vadd.f32 %v532_v30, %v531_v26  ;;  %v798_v57 = vadd.f32 %v797_v31, %v796_v27 }
  0xec   : > { %v522_v38 = vrot.slane %v521_v32, 1  ;;  %v787_v39 = vrot.slane %v786_v33, 1  ;;  %v811_v41 = vrot.slane %v810_v35, 4  ;;  %v1648_v42 = vadd.f32 %v794_v14, %v793_v63 }
  0xed   : > { %v543_v43 = vrot.slane %v542_v36, 1  ;;  %v534_v45 = vrot.slane %v533_v37, 2  ;;  %v799_v46 = vrot.slane %v798_v57, 2  ;;  %v808_v49 = vrot.slane %v807_v62, 1 }
  0xee   : > { %v523_v48 = vadd.f32 %v522_v38, %v521_v32  ;;  %v547_v50 = vadd.f32 %v546_v40, %v545_v34  ;;  %v812_v52 = vadd.f32 %v811_v41, %v810_v35  ;;  %v1652_v55 = vadd.f32 %v787_v39, %v786_v33  ;;  %v1684_v33 = vpop.permute.xlu0 %638 }
  0xef   : > { %v544_v56 = vadd.f32 %v543_v43, %v542_v36  ;;  %v535_v58 = vadd.f32 %v534_v45, %v533_v37  ;;  %v800_v59 = vadd.f32 %v799_v46, %v798_v57  ;;  %v556_v51 = vrot.slane %v1650_v47, 1 }
  0xf0   : > { %v548_v60 = vrot.slane %v547_v50, 2  ;;  %v813_v0 = vrot.slane %v812_v52, 2  ;;  %v557_v63 = vrot.slane %v1650_v47, 2  ;;  %v558_v6 = vrot.slane %v1650_v47, 3 }
  0xf1   : > { %v536_v7 = vrot.slane %v535_v58, 1  ;;  %v801_v1 = vrot.slane %v800_v59, 1  ;;  %v559_v8 = vrot.slane %v1650_v47, 4  ;;  %v1658_v9 = vadd.f32 %v808_v49, %v807_v62 }
  0xf2   : > { %v549_v10 = vadd.f32 %v548_v60, %v547_v50  ;;  %v814_v11 = vadd.f32 %v813_v0, %v812_v52  ;;  %v561_v12 = vrot.slane %v1650_v47, 6  ;;  %v560_v16 = vrot.slane %v1650_v47, 5 }
  0xf3   : > { %v537_v14 = vadd.f32 %v536_v7, %v535_v58  ;;  %v1661_v15 = vadd.f32 %v801_v1, %v800_v59  ;;  %v571_v3 = vadd.f32 %v1650_v47, %v1632_v4  ;;  %v562_v18 = vrot.slane %v1650_v47, 7  ;;  %v625_v59 = vpop.permute.xlu1 %624 }
  0xf4   : > { %v550_v17 = vrot.slane %v549_v10, 1  ;;  %v572_v19 = vadd.f32 %v556_v51, %v1630_v2  ;;  %v573_v20 = vadd.f32 %v557_v63, %v1620_v53  ;;  %v574_v21 = vadd.f32 %v558_v6, %v523_v48 }
  0xf5   : > { %v575_v22 = vadd.f32 %v559_v8, %v1638_v13  ;;  %v576_v4 = vadd.f32 %v560_v16, %v537_v14  ;;  %v577_v23 = vadd.f32 %v561_v12, %v544_v56  ;;  %v815_v25 = vrot.slane %v814_v11, 1  ;;  %v1690_v14 = vpop.permute.xlu0 %708 }
  0xf6   : > { %v551_v24 = vadd.f32 %v550_v17, %v549_v10  ;;  %v579_v2 = vadd.f32 3.0, %v571_v3  ;;  %v580_v26 = vadd.f32 3.0, %v572_v19  ;;  %v581_v27 = vadd.f32 3.0, %v573_v20 }
  0xf7   : > { %v582_v28 = vadd.f32 3.0, %v574_v21  ;;  %v583_v53 = vadd.f32 3.0, %v575_v22  ;;  %v584_v29 = vadd.f32 3.0, %v576_v4  ;;  %v585_v31 = vadd.f32 3.0, %v577_v23 }
  0xf8   : > { %v578_v30 = vadd.f32 %v562_v18, %v551_v24  ;;  %v587_v32 = vmax.f32 %v579_v2, 0.0  ;;  %v588_v13 = vmax.f32 %v580_v26, 0.0  ;;  %v589_v34 = vmax.f32 %v581_v27, 0.0 }
  0xf9   : > { %v590_v35 = vmax.f32 %v582_v28, 0.0  ;;  %v591_v36 = vmax.f32 %v583_v53, 0.0  ;;  %v592_v62 = vmax.f32 %v584_v29, 0.0  ;;  %v593_v57 = vmax.f32 %v585_v31, 0.0 }
  0xfa   : > { %v586_v37 = vadd.f32 3.0, %v578_v30  ;;  %v595_v38 = vmin.f32 %v587_v32, 6.0  ;;  %v596_v39 = vmin.f32 %v588_v13, 6.0  ;;  %v597_v40 = vmin.f32 %v589_v34, 6.0 }
  0xfb   : > { %v598_v41 = vmin.f32 %v590_v35, 6.0  ;;  %v599_v43 = vmin.f32 %v591_v36, 6.0  ;;  %v600_v45 = vmin.f32 %v592_v62, 6.0  ;;  %v601_v48 = vmin.f32 %v593_v57, 6.0 }
  0xfc   : > { %v594_v46 = vmax.f32 %v586_v37, 0.0  ;;  %v603_v49 = vmul.f32 0.16666667, %v595_v38  ;;  %v604_v50 = vmul.f32 0.16666667, %v596_v39  ;;  %v1688_v60 = vadd.f32 %v1634_v5, %v1650_v47 }
  0xfd   : > { %v605_v52 = vmul.f32 0.16666667, %v597_v40  ;;  %v606_v56 = vmul.f32 0.16666667, %v598_v41  ;;  %v607_v58 = vmul.f32 0.16666667, %v599_v43  ;;  %v816_v27 = vadd.f32 %v815_v25, %v814_v11 }
  0xfe   : > { %v602_v0 = vmin.f32 %v594_v46, 6.0  ;;  %v608_v7 = vmul.f32 0.16666667, %v600_v45  ;;  %v609_v1 = vmul.f32 0.16666667, %v601_v48  ;;  %v611_v10 = vmul.f32 %v603_v49, %v571_v3 }
  0xff   : > { %v612_v17 = vmul.f32 %v604_v50, %v572_v19  ;;  %v613_v24 = vmul.f32 %v605_v52, %v573_v20  ;;  %v614_v2 = vmul.f32 %v606_v56, %v574_v21  ;;  %v615_v26 = vmul.f32 %v607_v58, %v575_v22  ;;  %v632_v20 = vpop.permute.xlu1 %631 }
 0x100   : > { %v610_v28 = vmul.f32 0.16666667, %v602_v0  ;;  %v616_v53 = vmul.f32 %v608_v7, %v576_v4  ;;  %v617_v29 = vmul.f32 %v609_v1, %v577_v23  ;;  %v710_v5 = vrot.slane %v1690_v14, 1 }
 0x101   : > { %v655_v31 = vrot.slane %v612_v17, 7  ;;  %v657_v32 = vrot.slane %v613_v24, 6  ;;  %v659_v13 = vrot.slane %v614_v2, 5  ;;  %v661_v35 = vrot.slane %v615_v26, 4 }
 0x102   : > { %v618_v34 = vmul.f32 %v610_v28, %v578_v30  ;;  %v664_v36 = vrot.slane %v616_v53, 3  ;;  %v667_v3 = vrot.slane %v617_v29, 2  ;;  %v711_v19 = vrot.slane %v1690_v14, 2 }
 0x103   : > { %v656_v62 = vsel %vm480_vm2, %v655_v31, %v611_v10  ;;  %v1698_v11 = vadd.f32 %v1622_v54, %v556_v51  ;;  %v1703_v21 = vadd.f32 %v1618_v44, %v557_v63  ;;  %v1709_v23 = vadd.f32 %v1652_v55, %v558_v6  ;;  %v646_v38 = vpop.permute.xlu1 %645 }
 0x104   : > { %v658_v22 = vsel %vm482_vm1, %v657_v32, %v656_v62  ;;  %v670_v4 = vrot.slane %v618_v34, 1  ;;  %v1714_v25 = vadd.f32 %v1648_v42, %v559_v8  ;;  %v1720_v44 = vadd.f32 %v1661_v15, %v560_v16 }
 0x105   : > { %v660_v54 = vsel %vm484_vm3, %v659_v13, %v658_v22  ;;  %v1725_v51 = vadd.f32 %v1658_v9, %v561_v12  ;;  %v1729_v55 = vadd.f32 %v816_v27, %v562_v18  ;;  %v825_v42 = vadd.f32 3.0, %v1688_v60 }
 0x106   : > { %v663_v63 = vsel %vm662_vm6, %v661_v35, %v660_v54  ;;  %v826_v6 = vadd.f32 3.0, %v1698_v11  ;;  %v827_v8 = vadd.f32 3.0, %v1703_v21  ;;  %v828_v16 = vadd.f32 3.0, %v1709_v23 }
 0x107   : > { %v666_v15 = vsel %vm665_vm7, %v664_v36, %v663_v63  ;;  %v829_v30 = vadd.f32 3.0, %v1714_v25  ;;  %v830_v9 = vadd.f32 3.0, %v1720_v44  ;;  %v831_v12 = vadd.f32 3.0, %v1725_v51 }
 0x108   : > { %v669_v47 = vsel %vm668_vm8, %v667_v3, %v666_v15  ;;  %v832_v18 = vadd.f32 3.0, %v1729_v55  ;;  %v833_v37 = vmax.f32 %v825_v42, 0.0  ;;  %v834_v39 = vmax.f32 %v826_v6, 0.0 }
 0x109   : > { %v672_v57 = vsel %vm671_vm9, %v670_v4, %v669_v47  ;;  %v835_v40 = vmax.f32 %v827_v8, 0.0  ;;  %v836_v41 = vmax.f32 %v828_v16, 0.0  ;;  %v837_v49 = vmax.f32 %v829_v30, 0.0 }
 0x10a   : > { %v676_v43 = vmul.f32 %v672_v57, %v1684_v33  ;;  %v674_v45 = vmul.f32 %v672_v57, %v625_v59  ;;  %v675_v46 = vmul.f32 %v672_v57, %v632_v20  ;;  %v677_v48 = vmul.f32 %v672_v57, %v646_v38 }
 0x10b   : > { %v838_v50 = vmax.f32 %v830_v9, 0.0  ;;  %v839_v52 = vmax.f32 %v831_v12, 0.0  ;;  %v840_v56 = vmax.f32 %v832_v18, 0.0  ;;  %v841_v33 = vmin.f32 %v833_v37, 6.0 }
 0x10c   : > { %v692_v58 = vsel %vm305_vm0, %v676_v43, 0.0  ;;  %v678_v0 = vsel %vm305_vm0, %v674_v45, 0.0  ;;  %v685_v7 = vsel %vm305_vm0, %v675_v46, 0.0  ;;  %v699_v1 = vsel %vm305_vm0, %v677_v48, 0.0 }
 0x10d   : > { %v693_v10 = vrot.slane %v692_v58, 4  ;;  %v679_v17 = vrot.slane %v678_v0, 4  ;;  %v686_v24 = vrot.slane %v685_v7, 4  ;;  %v700_v2 = vrot.slane %v699_v1, 4 }
 0x10e   : > { %v842_v59 = vmin.f32 %v834_v39, 6.0  ;;  %v843_v26 = vmin.f32 %v835_v40, 6.0  ;;  %v844_v27 = vmin.f32 %v836_v41, 6.0  ;;  %v845_v32 = vmin.f32 %v837_v49, 6.0 }
 0x10f   : > { %v694_v28 = vadd.f32 %v693_v10, %v692_v58  ;;  %v680_v53 = vadd.f32 %v679_v17, %v678_v0  ;;  %v687_v29 = vadd.f32 %v686_v24, %v685_v7  ;;  %v701_v31 = vadd.f32 %v700_v2, %v699_v1 }
 0x110   : > { %v846_v13 = vmin.f32 %v838_v50, 6.0  ;;  %v847_v34 = vmin.f32 %v839_v52, 6.0  ;;  %v848_v35 = vmin.f32 %v840_v56, 6.0  ;;  %v849_v22 = vmul.f32 0.16666667, %v841_v33 }
 0x111   : > { %v695_v36 = vrot.slane %v694_v28, 2  ;;  %v681_v3 = vrot.slane %v680_v53, 2  ;;  %v688_v62 = vrot.slane %v687_v29, 2  ;;  %v702_v20 = vrot.slane %v701_v31, 2 }
 0x112   : > { %v850_v4 = vmul.f32 0.16666667, %v842_v59  ;;  %v851_v54 = vmul.f32 0.16666667, %v843_v26  ;;  %v852_v15 = vmul.f32 0.16666667, %v844_v27  ;;  %v857_v48 = vmul.f32 %v849_v22, %v1688_v60 }
 0x113   : > { %v696_v63 = vadd.f32 %v695_v36, %v694_v28  ;;  %v682_v42 = vadd.f32 %v681_v3, %v680_v53  ;;  %v689_v6 = vadd.f32 %v688_v62, %v687_v29  ;;  %v703_v8 = vadd.f32 %v702_v20, %v701_v31 }
 0x114   : > { %v853_v16 = vmul.f32 0.16666667, %v845_v32  ;;  %v854_v30 = vmul.f32 0.16666667, %v846_v13  ;;  %v712_v37 = vrot.slane %v1690_v14, 3  ;;  %v858_v38 = vmul.f32 %v850_v4, %v1698_v11 }
 0x115   : > { %v697_v9 = vrot.slane %v696_v63, 1  ;;  %v683_v47 = vrot.slane %v682_v42, 1  ;;  %v690_v12 = vrot.slane %v689_v6, 1  ;;  %v704_v18 = vrot.slane %v703_v8, 1 }
 0x116   : > { %v856_v57 = vmul.f32 0.16666667, %v848_v35  ;;  %v859_v39 = vmul.f32 %v851_v54, %v1703_v21  ;;  %v855_v45 = vmul.f32 0.16666667, %v847_v34  ;;  %v860_v49 = vmul.f32 %v852_v15, %v1709_v23 }
 0x117   : > { %v698_v40 = vadd.f32 %v697_v9, %v696_v63  ;;  %v684_v41 = vadd.f32 %v683_v47, %v682_v42  ;;  %v691_v43 = vadd.f32 %v690_v12, %v689_v6  ;;  %v705_v46 = vadd.f32 %v704_v18, %v703_v8  ;;  %v871_v42 = vpop.permute.xlu1 %870  ;;  %v878_v8 = vpop.permute.xlu0 %877 }
 0x118   : > { %v862_v50 = vmul.f32 %v854_v30, %v1720_v44  ;;  %v861_v21 = vmul.f32 %v853_v16, %v1714_v25  ;;  %v864_v58 = vmul.f32 %v856_v57, %v1729_v55  ;;  %v901_v0 = vrot.slane %v858_v38, 7 }
 0x119   : > { %v719_v52 = vadd.f32 %v711_v19, %v698_v40  ;;  %v717_v56 = vadd.f32 %v1690_v14, %v684_v41  ;;  %v718_v11 = vadd.f32 %v710_v5, %v691_v43  ;;  %v903_v7 = vrot.slane %v859_v39, 6 }
 0x11a   : > { %v905_v1 = vrot.slane %v860_v49, 5  ;;  %v863_v23 = vmul.f32 %v855_v45, %v1725_v51  ;;  %v720_v17 = vadd.f32 %v712_v37, %v705_v46  ;;  %v902_v19 = vsel %vm480_vm2, %v901_v0, %v857_v48 }
 0x11b   : > { %v1167_v60 = vmul.f32 -1.442695, %v717_v56  ;;  %v1168_v10 = vmul.f32 -1.442695, %v718_v11  ;;  %v1169_v44 = vmul.f32 -1.442695, %v719_v52  ;;  %v904_v2 = vsel %vm482_vm1, %v903_v7, %v902_v19  ;;  %v885_v30 = vpop.permute.xlu1 %884  ;;  %v892_v18 = vpop.permute.xlu0 %891 }
 0x11c   : > { %v909_v24 = vrot.slane %v862_v50, 3  ;;  %v907_v14 = vrot.slane %v861_v21, 4  ;;  %v906_v5 = vsel %vm484_vm3, %v905_v1, %v904_v2  ;;  %v913_v25 = vrot.slane %v864_v58, 1 }
 0x11d   : > { %1235 = vpow2.f32 %v1167_v60  ;;  %v911_v33 = vrot.slane %v863_v23, 2  ;;  %v1170_v59 = vmul.f32 -1.442695, %v720_v17 }
 0x11e   : > { %1237 = vpow2.f32 %v1168_v10  ;;  %v908_v55 = vsel %vm662_vm6, %v907_v14, %v906_v5 }
 0x11f   : > { %1239 = vpow2.f32 %v1169_v44  ;;  %v910_v51 = vsel %vm665_vm7, %v909_v24, %v908_v55  ;;  %v951_v60 = vpop.permute.xlu1 %950 }
 0x120   : > { %v912_v26 = vsel %vm668_vm8, %v911_v33, %v910_v51  ;;  %1241 = vpow2.f32 %v1170_v59  ;;  %v952_v10 = vrot.slane %v951_v60, 1  ;;  %v953_v24 = vrot.slane %v951_v60, 2 }
 0x121   : > { %v914_v27 = vsel %vm671_vm9, %v913_v25, %v912_v26  ;;  %v954_v55 = vrot.slane %v951_v60, 3 }
 0x122   : > { %v916_v6 = vmul.f32 %v914_v27, %v871_v42  ;;  %v917_v16 = vmul.f32 %v914_v27, %v878_v8  ;;  %v918_v12 = vmul.f32 %v914_v27, %v885_v30  ;;  %v919_v39 = vmul.f32 %v914_v27, %v892_v18  ;;  %v1270_v18 = vld [vmem:[%s1519_s15 + $0x10] sm:$0xff] }
 0x124   : > { %v920_v15 = vsel %vm305_vm0, %v916_v6, 0.0  ;;  %v927_v47 = vsel %vm305_vm0, %v917_v16, 0.0  ;;  %v934_v38 = vsel %vm305_vm0, %v918_v12, 0.0  ;;  %v941_v45 = vsel %vm305_vm0, %v919_v39, 0.0 }
 0x125   : > { %v921_v9 = vrot.slane %v920_v15, 4  ;;  %v928_v57 = vrot.slane %v927_v47, 4  ;;  %v935_v43 = vrot.slane %v934_v38, 4  ;;  %v942_v50 = vrot.slane %v941_v45, 4 }
 0x127   : > { %v922_v37 = vadd.f32 %v921_v9, %v920_v15  ;;  %v929_v41 = vadd.f32 %v928_v57, %v927_v47  ;;  %v936_v49 = vadd.f32 %v935_v43, %v934_v38  ;;  %v943_v21 = vadd.f32 %v942_v50, %v941_v45  ;;  %v1269_v9 = vld [vmem:[%s1519_s15 + $0x18] sm:$0xff]  ;;  %v1271_v43 = vld [vmem:[%s1519_s15 + $0x28] sm:$0xff] }
 0x129   : > { %v923_v40 = vrot.slane %v922_v37, 2  ;;  %v930_v48 = vrot.slane %v929_v41, 2  ;;  %v937_v11 = vrot.slane %v936_v49, 2  ;;  %v944_v1 = vrot.slane %v943_v21, 2 }
 0x12a   : > { %v1236_v28 = vpop.eup %1235 }
 0x12b   : > { %v1238_v53 = vpop.eup %1237  ;;  %v733_v29 = vadd.f32 1.0, %v1236_v28  ;;  %v924_v46 = vadd.f32 %v923_v40, %v922_v37  ;;  %v931_v56 = vadd.f32 %v930_v48, %v929_v41  ;;  %v938_v7 = vadd.f32 %v937_v11, %v936_v49  ;;  %v1272_v48 = vld [vmem:[%s1519_s15 + $0x20] sm:$0xff] }
 0x12c   : > { %v1240_v31 = vpop.eup %1239  ;;  %v734_v32 = vadd.f32 1.0, %v1238_v53  ;;  %v945_v17 = vadd.f32 %v944_v1, %v943_v21  ;;  %v1274_v1 = vld [vmem:[%s1519_s15 + $0x30] sm:$0xff] }
 0x12d   : > { %1243 = vrcp.f32 %v733_v29  ;;  %v735_v13 = vadd.f32 1.0, %v1240_v31  ;;  %v1242_v34 = vpop.eup %1241  ;;  %v925_v52 = vrot.slane %v924_v46, 1  ;;  %v932_v0 = vrot.slane %v931_v56, 1 }
 0x12e   : > { %1245 = vrcp.f32 %v734_v32  ;;  %v736_v35 = vadd.f32 1.0, %v1242_v34  ;;  %v939_v44 = vrot.slane %v938_v7, 1  ;;  %v946_v14 = vrot.slane %v945_v17, 1 }
 0x12f   : > { %1247 = vrcp.f32 %v735_v13  ;;  %v926_v58 = vadd.f32 %v925_v52, %v924_v46  ;;  %v933_v23 = vadd.f32 %v932_v0, %v931_v56 }
 0x130   : > { %1249 = vrcp.f32 %v736_v35  ;;  %v940_v2 = vadd.f32 %v939_v44, %v938_v7  ;;  %v947_v33 = vadd.f32 %v946_v14, %v945_v17 }
 0x131   : > { %v959_v19 = vadd.f32 %v951_v60, %v926_v58  ;;  %v960_v5 = vadd.f32 %v952_v10, %v933_v23  ;;  %v1273_v58 = vld [vmem:[%s1519_s15 + $0x38] sm:$0xff] }
 0x132   : > { %v961_v59 = vadd.f32 %v953_v24, %v940_v2  ;;  %v962_v26 = vadd.f32 %v954_v55, %v947_v33 }
 0x133   : > { %v1171_v25 = vmul.f32 -1.442695, %v959_v19  ;;  %v1172_v51 = vmul.f32 -1.442695, %v960_v5 }
 0x134   : > { %v1173_v27 = vmul.f32 -1.442695, %v961_v59  ;;  %v1174_v28 = vmul.f32 -1.442695, %v962_v26 }
 0x135   : > { %1251 = vpow2.f32 %v1171_v25 }
 0x136   : > { %1253 = vpow2.f32 %v1172_v51 }
 0x137   : > { %1255 = vpow2.f32 %v1173_v27 }
 0x138   : > { %1257 = vpow2.f32 %v1174_v28 }
 0x13a   : > { %v1244_v36 = vpop.eup %1243 }
 0x13b   : > { %v990_v3 = vrot.slane %v1244_v36, %v1559_v61  ;;  %v1246_v62 = vpop.eup %1245 }
 0x13c   : > { %v1001_v20 = vrot.slane %v1246_v62, %v1559_v61  ;;  %v1248_v22 = vpop.eup %1247 }
 0x13d   : > { %996 = vbcast.lane.b32.xlu1 %v990_v3, 264  ;;  %992 = vbcast.lane.b32.xlu0 %v990_v3, 256  ;;  %v1012_v4 = vrot.slane %v1248_v22, %v1559_v61  ;;  %v1250_v54 = vpop.eup %1249  ;;  %v1267_v22 = vld [vmem:[%s1519_s15 + $0x8] sm:$0xff] }
 0x13e   : > { %v1023_v63 = vrot.slane %v1250_v54, %v1559_v61 }
 0x141   : > { %1007 = vbcast.lane.b32.xlu1 %v1001_v20, 264  ;;  %1003 = vbcast.lane.b32.xlu0 %v1001_v20, 256 }
 0x142   : > { %v1252_v53 = vpop.eup %1251 }
 0x143   : > { %v975_v29 = vadd.f32 1.0, %v1252_v53  ;;  %v1254_v31 = vpop.eup %1253 }
 0x144   : > { %v976_v32 = vadd.f32 1.0, %v1254_v31  ;;  %v1256_v13 = vpop.eup %1255 }
 0x145   : > { %1018 = vbcast.lane.b32.xlu1 %v1012_v4, 264  ;;  %1014 = vbcast.lane.b32.xlu0 %v1012_v4, 256  ;;  %1259 = vrcp.f32 %v975_v29  ;;  %v977_v34 = vadd.f32 1.0, %v1256_v13  ;;  %v1258_v35 = vpop.eup %1257 }
 0x146   : > { %1261 = vrcp.f32 %v976_v32  ;;  %v978_v36 = vadd.f32 1.0, %v1258_v35 }
 0x147   : > { %1263 = vrcp.f32 %v977_v34 }
 0x148   : > { %1265 = vrcp.f32 %v978_v36 }
 0x149   : > { %1029 = vbcast.lane.b32.xlu1 %v1023_v63, 264  ;;  %1025 = vbcast.lane.b32.xlu0 %v1023_v63, 256  ;;  %v1268_v63 = vld [vmem:[%s1519_s15] sm:$0xff]  ;;  %s1373_s15 = smov [#allocation5]  }
 0x14a   : > { %s1307_s9 = sshll.u32 %s1373_s15, 4  ;;  %s1308_s9 = int_to_ptr.vmem [resolvable:$false] %s1307_s9 }
 0x14b   : > { %s1309_s8 = scalar_lea.vmem %s1308_s9, 2048  ;;  %p1310_p5 = scmp.lt.s32.totalorder %s1812_s22, %s1308_s9 }
 0x14c   : > { %p1311_p7 = scmp.lt.s32.totalorder %s1309_s8, %s1303_s21 }
 0x14e   : > { %p1312_p8 = por %p1311_p7, %p1310_p5 }
 0x150   : > { %p1313_p10 = pnand %p1312_p8, %p1306_p4 }
 0x152   : > { %v1260_v3 = vpop.eup %1259 }
 0x153   : > { %v1042_v54 = vrot.slane %v1260_v3, %v1559_v61  ;;  %v1262_v6 = vpop.eup %1261 }
 0x154   : > { %v1046_v12 = vrot.slane %v1262_v6, %v1559_v61  ;;  %v1264_v57 = vpop.eup %1263 }
 0x155   : > { %v1050_v46 = vrot.slane %v1264_v57, %v1559_v61  ;;  %v1266_v50 = vpop.eup %1265 }
 0x156   : > { %v1054_v7 = vrot.slane %v1266_v50, %v1559_v61 }
 0x1af   : > { %v997_v62 = vpop.permute.xlu1 %996  ;;  %v993_v20 = vpop.permute.xlu0 %992 }
 0x1b0   : > { %v1032_v4 = vmul.f32 %v1267_v22, %v997_v62  ;;  %v1031_v42 = vmul.f32 %v1268_v63, %v993_v20 }
 0x1b2   : > { %v1056_v8 = vmul.f32 %v1042_v54, %v1032_v4  ;;  %v1055_v15 = vmul.f32 %v1042_v54, %v1031_v42 }
 0x1b3   : > { %v1008_v16 = vpop.permute.xlu1 %1007  ;;  %v1004_v30 = vpop.permute.xlu0 %1003 }
 0x1b4   : > { %1064 = vst.msk [vmem:[%s1782_s20 + $0x8] sm:$0xff] %vm305_vm0, %v1056_v8  ;;  %1063 = vst.msk [vmem:[%s1782_s20] sm:$0xff] %vm305_vm0, %v1055_v15  ;;  %v1034_v47 = vmul.f32 %v1269_v9, %v1008_v16  ;;  %v1033_v37 = vmul.f32 %v1270_v18, %v1004_v30 }
 0x1b6   : > { %v1058_v38 = vmul.f32 %v1046_v12, %v1034_v47  ;;  %v1057_v39 = vmul.f32 %v1046_v12, %v1033_v37 }
 0x1b7   : > { %v1019_v40 = vpop.permute.xlu1 %1018  ;;  %v1015_v41 = vpop.permute.xlu0 %1014 }
 0x1b8   : > { %1066 = vst.msk [vmem:[%s1782_s20 + $0x18] sm:$0xff] %vm305_vm0, %v1058_v38  ;;  %1065 = vst.msk [vmem:[%s1782_s20 + $0x10] sm:$0xff] %vm305_vm0, %v1057_v39  ;;  %v1036_v45 = vmul.f32 %v1271_v43, %v1019_v40  ;;  %v1035_v49 = vmul.f32 %v1272_v48, %v1015_v41 }
 0x1ba   : > { %v1060_v52 = vmul.f32 %v1050_v46, %v1036_v45  ;;  %v1059_v56 = vmul.f32 %v1050_v46, %v1035_v49 }
 0x1bb   : > { %v1030_v11 = vpop.permute.xlu1 %1029  ;;  %v1026_v21 = vpop.permute.xlu0 %1025 }
 0x1bc   : > { %1068 = vst.msk [vmem:[%s1782_s20 + $0x28] sm:$0xff] %vm305_vm0, %v1060_v52  ;;  %1067 = vst.msk [vmem:[%s1782_s20 + $0x20] sm:$0xff] %vm305_vm0, %v1059_v56  ;;  %v1038_v0 = vmul.f32 %v1273_v58, %v1030_v11  ;;  %v1037_v60 = vmul.f32 %v1274_v1, %v1026_v21 }
 0x1be   : > { %v1062_v10 = vmul.f32 %v1054_v7, %v1038_v0  ;;  %v1061_v23 = vmul.f32 %v1054_v7, %v1037_v60 }
 0x1c0   : > { %1070 = vst.msk [vmem:[%s1782_s20 + $0x38] sm:$0xff] %vm305_vm0, %v1062_v10  ;;  %1069 = vst.msk [vmem:[%s1782_s20 + $0x30] sm:$0xff] %vm305_vm0, %v1061_v23 }
 0x1c1   : > { %1316 = shalt.err (!%p1313_p10)
}
 0x1c2   : > { %s1317_s16 = scalar_lea.hbm %s1810_s28, 1024  ;;  %s1321_s20 = scalar_lea.hbm %s1866_s7, 2048 }
 0x1c3   : > { %p1318_p0 = scmp.ne.s32.totalorder %s1810_s28, %s1317_s16  ;;  %p1322_p1 = scmp.lt.s32.totalorder %s1810_s28, %s1866_s7 }
 0x1c4   : > { %p1323_p3 = scmp.lt.s32.totalorder %s1321_s20, %s1317_s16 }
 0x1c5   : > { %p1319_p2 = pnand %p1318_p0, %p1875_p12 }
 0x1c6   : > { %p1324_p6 = por %p1323_p3, %p1322_p1 }
 0x1c7   : > { %p1320_p9 = pneg %p1319_p2 }
 0x1c9   : > { %p1325_p11 = pnand %p1324_p6, %p1320_p9 }
 0x1cb   : > { %1328 = shalt.err (!%p1325_p11)
}
 0x1cc   : > { %s1374_s29 = smov 128   ;;  %s1375_s21 = smov 8  }
 0x1cd   : > { %1184 = dma.vmem_to_hbm [thread:$0]  (%p1875_p12), %s1812_s22, 1024, %s1810_s28, %s1072_s19, %s1374_s29, %s1374_s29, %s1375_s21  }
 0x1ce PF: > { %s1100_s15 = sand.u32 1, %s1355_s24   ;;  %p1876_p13 = scmp.ne.s32.totalorder %s1872_s14, 0 }
 0x1cf   : > { %p1877_p4 = scmp.ge.s32.totalorder %s1367_s27, 2  ;;  %s1101_s9 = scalar_lea.sflag [#allocation4], %s1100_s15 }
 0x1d1   : > { %p1191_p5 = pnand %p1877_p4, %p1876_p13 }
 0x1d3   : > { %p1192_p7 = pneg %p1191_p5 }
 0x1d5   : > { %1350 = dma.done.wait (%p1192_p7), %s1101_s9, 1024  }
 0x1d6   : > { %1352 = vsyncadd (%p1192_p7), %s1101_s9, 4294966272  ;;  %p20_p8 = scmp.ge.s32.totalorder %s1441_s30, 4   ;;  %s1878_s24 = smov %s1359_s25 }
 0x1d7   : > { %s1879_s25 = smov %s1363_s26  ;;  %s1880_s26 = smov %s1453_s10 }
 0x1d8   : > { %s1881_s27 = smov %s1441_s30  ;;  %22 = sbr.rel (!%p20_p8) target bundleno = 5 (0x5), region = 93 }
 0x1dd   :  { %1106 = vsyncpa [#allocation3], 1 }
 0x1de   :  { %1108 = vsyncpa [#allocation3 + $0x1], 1 }
 0x1df   :  { %1109 = vsyncpa [#allocation4], 1 }
 0x1e0   :  { %1111 = vsyncpa [#allocation4 + $0x1], 1 }

</bundles_post_ra>
